<compile_context>
chip_gen: v6e
topology: v6e:2x2x1
jax: 0.10.0
libtpu: 0.0.40
codegen_flags: <defaults>
</compile_context>

<pallas_src>
import jax
import jax.numpy as jnp
from jax import lax
from jax.experimental import pallas as pl
from jax.experimental.pallas import tpu as pltpu


def _linear_kernel(x_ref, w_ref, b_ref, o_ref):
    # x_ref: (B, K) f32    w_ref: (K, N) mxu-dtype (resident across grid steps
    # in the multi-step variant)    b_ref: (1, N) f32    o_ref: (B, N) f32
    x = x_ref[...].astype(w_ref.dtype)            # tiny VPU cast; MXU runs in w dtype
    # Exact-f32 path: force full-precision MXU passes. bf16 path: default.
    prec = (lax.Precision.HIGHEST if w_ref.dtype == jnp.float32
            else lax.Precision.DEFAULT)
    acc = jnp.dot(x, w_ref[...], preferred_element_type=jnp.float32,
                  precision=prec)
    o_ref[...] = (acc + b_ref[...]).astype(o_ref.dtype)   # bias add in f32


def prepare_decoder_params(weight, bias, mxu_dtype=jnp.bfloat16):
    """One-time parameter preparation (NOT in the per-call path).

    weight: (feature_num, k) PyTorch nn.Linear layout; bias: (feature_num,).
    Returns the weight transposed to (k, feature_num) and cast to the MXU
    streaming dtype, plus the bias reshaped to (1, feature_num) in f32.

    bf16 weight streaming (the default) is recommended on v5e, v6e and v7x:
    the MXU takes bf16 natively on all three, it halves weight HBM/VMEM bytes,
    and accumulation + bias add stay in f32.  Pass mxu_dtype=jnp.float32 for
    bit-faithful f32 semantics.
    """
    w_t = jnp.asarray(weight).T.astype(mxu_dtype)           # (k, N)
    b2d = jnp.asarray(bias, jnp.float32).reshape(1, -1)     # (1, N)
    return {"w_t": w_t, "b2d": b2d}


def _cost(n_x_elems, x_itemsize, w_t, b2d, out_elems, flops):
    return pl.CostEstimate(
        flops=flops,
        transcendentals=0,
        bytes_accessed=(n_x_elems * x_itemsize
                        + w_t.size * w_t.dtype.itemsize
                        + b2d.size * 4
                        + out_elems * 4))


def decoder_forward(x, params):
    """Single-shot forward.  x: (B, k) float32 -> (B, feature_num) float32."""
    w_t, b2d = params["w_t"], params["b2d"]
    b, k = x.shape
    k_w, n = w_t.shape
    assert k == k_w, f"feature mismatch: x has k={k}, weight has k={k_w}"

    return pl.pallas_call(
        _linear_kernel,
        out_shape=jax.ShapeDtypeStruct((b, n), jnp.float32),
        in_specs=[
            pl.BlockSpec(memory_space=pltpu.MemorySpace.VMEM),   # x
            pl.BlockSpec(memory_space=pltpu.MemorySpace.VMEM),   # w_t
            pl.BlockSpec(memory_space=pltpu.MemorySpace.VMEM),   # bias
        ],
        out_specs=pl.BlockSpec(memory_space=pltpu.MemorySpace.VMEM),
        cost_estimate=_cost(x.size, x.dtype.itemsize, w_t, b2d, b * n,
                            flops=2 * b * k * n),
    )(x, w_t, b2d)


def decoder_forward_steps(xs, params):
    """Repeated-call forward with a VMEM-resident weight.

    xs: (T, B, k) float32 -> (T, B, feature_num) float32.
    One pallas_call, grid=(T,).  The weight / bias BlockSpecs return a constant
    block index, so Pallas keeps them resident in VMEM across all T steps
    (single HBM fetch, single launch) instead of re-DMAing per call.
    """
    w_t, b2d = params["w_t"], params["b2d"]
    t, b, k = xs.shape
    k_w, n = w_t.shape
    assert k == k_w, f"feature mismatch: xs has k={k}, weight has k={k_w}"

    grid_spec = pltpu.PrefetchScalarGridSpec(
        num_scalar_prefetch=0,
        grid=(t,),
        in_specs=[
            pl.BlockSpec((None, b, k), lambda i: (i, 0, 0)),  # per-step x slab
            pl.BlockSpec((k_w, n), lambda i: (0, 0)),         # weight: constant -> resident
            pl.BlockSpec((1, n), lambda i: (0, 0)),           # bias: constant -> resident
        ],
        out_specs=pl.BlockSpec((None, b, n), lambda i: (i, 0, 0)),
    )
    return pl.pallas_call(
        _linear_kernel,
        out_shape=jax.ShapeDtypeStruct((t, b, n), jnp.float32),
        grid_spec=grid_spec,
        compiler_params=pltpu.CompilerParams(
            dimension_semantics=("arbitrary",)),
        cost_estimate=_cost(xs.size, xs.dtype.itemsize, w_t, b2d, t * b * n,
                            flops=2 * t * b * k * n),
    )(xs, w_t, b2d)


def make_params(key, feature_num, k):
    """Deterministic params matching nn.Linear(k, feature_num) with
    xavier_uniform_ weight init and PyTorch's default bias init."""
    kw, kb = jax.random.split(key)
    a = (6.0 / (k + feature_num)) ** 0.5                     # xavier_uniform
    weight = jax.random.uniform(kw, (feature_num, k), jnp.float32, -a, a)
    bb = 1.0 / (k ** 0.5)                                    # default bias init
    bias = jax.random.uniform(kb, (feature_num,), jnp.float32, -bb, bb)
    return weight, bias


if __name__ == "__main__":
    feature_num = 784
    k = 32
    batch = 8
    steps = 4

    key = jax.random.PRNGKey(0)
    kx, kp, ks = jax.random.split(key, 3)
    x = jax.random.normal(kx, (batch, k), dtype=jnp.float32)
    weight, bias = make_params(kp, feature_num, k)

    ref = x @ weight.T + bias                                # PyTorch forward

    # Exact-semantics path: f32 weight streaming, precision=HIGHEST dot.
    params_f32 = prepare_decoder_params(weight, bias, mxu_dtype=jnp.float32)
    out_f32 = decoder_forward(x, params_f32)
    jax.block_until_ready(out_f32)
    assert out_f32.shape == (batch, feature_num)
    assert jnp.allclose(out_f32, ref, atol=1e-5, rtol=1e-5)

    # Recommended path on v5e / v6e / v7x: bf16 weight + activation streaming
    # into the MXU (half the weight HBM bytes), f32 accumulate + f32 bias add.
    params_bf16 = prepare_decoder_params(weight, bias, mxu_dtype=jnp.bfloat16)
    out_bf16 = decoder_forward(x, params_bf16)
    jax.block_until_ready(out_bf16)
    assert out_bf16.shape == (batch, feature_num)
    assert jnp.allclose(out_bf16, ref, atol=2e-2, rtol=2e-2)

    # Repeated-call path: weight stays VMEM-resident across all steps.
    xs = jax.random.normal(ks, (steps, batch, k), dtype=jnp.float32)
    ref_steps = jnp.einsum("tbk,nk->tbn", xs, weight) + bias
    out_steps = decoder_forward_steps(xs, params_bf16)
    jax.block_until_ready(out_steps)
    assert out_steps.shape == (steps, batch, feature_num)
    assert jnp.allclose(out_steps, ref_steps, atol=2e-2, rtol=2e-2)

    print("KERNEL_OK")
</pallas_src>

<mosaic_0001>
module attributes {stable_mosaic.version = 11 : i64} {
  func.func @_linear_kernel(%arg0: memref<8x32xf32, #tpu.memory_space<vmem>>, %arg1: memref<32x784xf32, #tpu.memory_space<vmem>>, %arg2: memref<1x784xf32, #tpu.memory_space<vmem>>, %arg3: memref<8x784xf32, #tpu.memory_space<vmem>>) attributes {dimension_semantics = [], scalar_prefetch = 0 : i64, scratch_operands = 0 : i64, tpu.core_type = #tpu.core_type<tc>} {
    %c0 = arith.constant 0 : index
    %c0_0 = arith.constant 0 : index
    %0 = vector.load %arg0[%c0, %c0_0] : memref<8x32xf32, #tpu.memory_space<vmem>>, vector<8x32xf32>
    %c0_1 = arith.constant 0 : index
    %c0_2 = arith.constant 0 : index
    %1 = vector.load %arg1[%c0_1, %c0_2] : memref<32x784xf32, #tpu.memory_space<vmem>>, vector<32x784xf32>
    %cst = arith.constant dense<0.000000e+00> : vector<8x784xf32>
    %2 = tpu.matmul %0, %1, %cst {dimension_numbers = #tpu.dot_dimension_numbers<[1], [0], [0], [1], [0, 0, 1, 1], [], []>, precision = #tpu.contract_precision<fp32>} : vector<8x32xf32>, vector<32x784xf32>, vector<8x784xf32> -> vector<8x784xf32>
    %c0_3 = arith.constant 0 : index
    %c0_4 = arith.constant 0 : index
    %3 = vector.load %arg2[%c0_3, %c0_4] : memref<1x784xf32, #tpu.memory_space<vmem>>, vector<1x784xf32>
    %4 = vector.broadcast %3 : vector<1x784xf32> to vector<8x784xf32>
    %5 = arith.addf %2, %4 : vector<8x784xf32>
    %c0_5 = arith.constant 0 : index
    %c0_6 = arith.constant 0 : index
    %6 = vector.load %arg3[%c0_5, %c0_6] : memref<8x784xf32, #tpu.memory_space<vmem>>, vector<8x784xf32>
    tpu.vector_store %arg3[%c0_5, %c0_6], %5 {strides = array<i32>} : memref<8x784xf32, #tpu.memory_space<vmem>>, vector<8x784xf32>,
    return
  }
}

</mosaic_0001>

<bundles_post_ra>
// kernel: tpu_custom_call.1
= control target key start
LH: loop header
LB: loop body
LE: loop exit
PB: predicated region body
PF: predicated region fallthrough
CT: control target
= control target key end

     0   :  { %8 = vsyncpa [#allocation3], 0  ;;  %s2999_s0 = inlined_call_operand.hbm [shape: f32[8,32], index: 0, kind: input, shape index: {}]   ;;  %s3000_s1 = inlined_call_operand.hbm [shape: f32[32,784], index: 1, kind: input, shape index: {}]   ;;  %s3001_s2 = inlined_call_operand.hbm [shape: f32[1,784], index: 2, kind: input, shape index: {}]   ;;  %s3002_s3 = inlined_call_operand.hbm [shape: f32[8,784], index: 3, kind: output, shape index: {}]  }
   0x1   :  { %9 = vsyncpa [#allocation6], 0 }
   0x2   :  { %10 = vsyncpa [#allocation4], 0  ;;  %s2450_s12 = smov [#allocation5]  }
   0x3   :  { %s26_s13 = sshll.u32 %s2450_s12, 4  ;;  %s27_s13 = int_to_ptr.vmem [resolvable:$true] %s26_s13 }
   0x4   :  { %s2372_s14 = scalar_lea.vmem %s27_s13, 3584  ;;  %p2377_p1 = scmp.lt.s32.totalorder %s27_s13, %s27_s13 }
   0x5   :  { %p2373_p0 = scmp.ne.s32.totalorder %s27_s13, %s2372_s14  ;;  %p2378_p2 = scmp.lt.s32.totalorder %s2372_s14, %s2372_s14 }
   0x7   :  { %p2379_p3 = por %p2378_p2, %p2377_p1 }
   0x9   :  { %p2380_p4 = pnand %p2379_p3, %p2373_p0 }
   0xb   :  { %2383 = shalt.err (!%p2380_p4)
}
   0xc   :  { %s2451_s15 = smov 896   ;;  %s2452_s16 = smov 56  }
   0xd   :  { %32 = dma.hbm_to_vmem [thread:$0]  %s3000_s1, 3584, %s27_s13, [#allocation6], %s2451_s15, %s2451_s15, %s2452_s16  }
   0xe   :  { %s2453_s19 = smov [#allocation2]   ;;  %s2454_s21 = smov [#allocation7]  }
   0xf   :  { %s17_s20 = sshll.u32 %s2453_s19, 4  ;;  %s39_s22 = sshll.u32 %s2454_s21, 4  ;;  %s18_s20 = int_to_ptr.vmem [resolvable:$true] %s17_s20  ;;  %s40_s22 = int_to_ptr.vmem [resolvable:$true] %s39_s22 }
  0x10   :  { %s2392_s23 = scalar_lea.vmem %s18_s20, 128  ;;  %p2397_p6 = scmp.lt.s32.totalorder %s18_s20, %s18_s20 }
  0x11   :  { %p2393_p5 = scmp.ne.s32.totalorder %s18_s20, %s2392_s23  ;;  %p2398_p7 = scmp.lt.s32.totalorder %s2392_s23, %s2392_s23 }
  0x13   :  { %p2399_p8 = por %p2398_p7, %p2397_p6 }
  0x15   :  { %p2400_p9 = pnand %p2399_p8, %p2393_p5 }
  0x17   :  { %2403 = shalt.err (!%p2400_p9)
}
  0x18   :  { %20 = dma.hbm_to_vmem [thread:$0]  %s2999_s0, 128, %s18_s20, [#allocation3]  }
  0x19   :  { %s2412_s26 = scalar_lea.vmem %s40_s22, 112  ;;  %s2416_s1 = scalar_lea.vmem %s40_s22, 128 }
  0x1a   :  { %p2413_p10 = scmp.ne.s32.totalorder %s40_s22, %s2412_s26  ;;  %p2417_p11 = scmp.lt.s32.totalorder %s40_s22, %s40_s22 }
  0x1b   :  { %p2418_p12 = scmp.lt.s32.totalorder %s2416_s1, %s2412_s26 }
  0x1d   :  { %p2419_p13 = por %p2418_p12, %p2417_p11 }
  0x1f   :  { %p2420_p0 = pnand %p2419_p13, %p2413_p10 }
  0x21   :  { %2423 = shalt.err (!%p2420_p0)
}
  0x22   :  { %42 = dma.hbm_to_vmem [thread:$0]  %s3001_s2, 112, %s40_s22, [#allocation6]  }
  0x23   :  { %2444 = dma.done.wait [#allocation3], 128  }
  0x24   :  { %2445 = vsyncadd [#allocation3], 4294967168 }
  0x25   :  { %2446 = dma.done.wait [#allocation6], 3696  }
  0x26   :  { %2447 = vsyncadd [#allocation6], 4294963600  ;;  %v2455_v0 = vmov 0.0   ;;  %v75_v1 = vld [vmem:[#allocation5 + $0xb0] sm:$0xff]  ;;  %v74_v2 = vld [vmem:[#allocation5 + $0xa8] sm:$0xff]  ;;  %vm118_vm0 = vcmask 261120  }
  0x27   :  { %194 = vmatprep.mubr.f32.mxu0 %v2455_v0  ;;  %310 = vmatprep.mubr.f32.mxu1 %v2455_v0  ;;  %v68_v3 = vld [vmem:[#allocation5 + $0x78] sm:$0xff]  ;;  %v2489_v4 = vand.u32 4294901760, %v75_v1  ;;  %v2491_v5 = vand.u32 4294901760, %v74_v2  ;;  %v67_v7 = vld [vmem:[#allocation5 + $0x70] sm:$0xff]  ;;  %v61_v8 = vld [vmem:[#allocation5 + $0x40] sm:$0xff]  ;;  %vm2456_vm1 = vmmov 0  }
  0x28   :  { %v2493_v6 = vand.u32 4294901760, %v68_v3  ;;  %v60_v9 = vld [vmem:[#allocation5 + $0x38] sm:$0xff]  ;;  %v2495_v10 = vand.u32 4294901760, %v67_v7  ;;  %v2497_v11 = vand.u32 4294901760, %v61_v8  ;;  %v54_v13 = vld [vmem:[#allocation5 + $0x8] sm:$0xff]  ;;  %v53_v14 = vld [vmem:[#allocation5] sm:$0xff] }
  0x29   :  { %v2499_v12 = vand.u32 4294901760, %v60_v9  ;;  %v52_v15 = vld [vmem:[#allocation2] sm:$0xff]  ;;  %147 = vmatprep.subr.mxu0 %v2489_v4  ;;  %v2502_v16 = vand.u32 4294901760, %v54_v13  ;;  %v2505_v17 = vsub.f32 %v75_v1, %v2489_v4  ;;  %v2507_v18 = vand.u32 4294901760, %v53_v14  ;;  %v77_v56 = vld [vmem:[#allocation5 + $0xc0] sm:$0xff]  ;;  %v70_v58 = vld [vmem:[#allocation5 + $0x88] sm:$0xff] }
  0x2a   :  { %v2510_v19 = vsub.f32 %v74_v2, %v2491_v5  ;;  %149 = vmatpush1.msra.mxu0 %v2491_v5  ;;  %v2514_v20 = vsub.f32 %v68_v3, %v2493_v6  ;;  %v120_v21 = vsel %vm118_vm0, %v52_v15, 0  ;;  %v2518_v22 = vsub.f32 %v67_v7, %v2495_v10  ;;  %v76_v57 = vld [vmem:[#allocation5 + $0xb8] sm:$0xff]  ;;  %v69_v60 = vld [vmem:[#allocation5 + $0x80] sm:$0xff]  ;;  %v63_v62 = vld [vmem:[#allocation5 + $0x50] sm:$0xff]  ;;  %s2457_s0 = smov [#allocation8]  }
  0x2b   :  { %v2521_v23 = vsub.f32 %v61_v8, %v2497_v11  ;;  %151 = vmatprep.subr.mxu0 %v2493_v6  ;;  %v232_v24 = vand.u32 4294901760, %v2505_v17  ;;  %v2526_v26 = vand.u32 4294901760, %v120_v21  ;;  %v2529_v27 = vsub.f32 %v60_v9, %v2499_v12  ;;  %v62_v1 = vld [vmem:[#allocation5 + $0x48] sm:$0xff]  ;;  %v56_v3 = vld [vmem:[#allocation5 + $0x18] sm:$0xff]  ;;  %v55_v9 = vld [vmem:[#allocation5 + $0x10] sm:$0xff]  ;;  %s2250_s2 = sshll.u32 %s2457_s0, 4  ;;  %s2251_s2 = int_to_ptr.vmem [resolvable:$true] %s2250_s2 }
  0x2c   :  { %v238_v25 = vand.u32 4294901760, %v2510_v19  ;;  %153 = vmatpush1.msra.mxu0 %v2495_v10  ;;  %v244_v28 = vand.u32 4294901760, %v2514_v20  ;;  %v250_v29 = vand.u32 4294901760, %v2518_v22  ;;  %v2536_v31 = vsub.f32 %v54_v13, %v2502_v16  ;;  %s2424_s29 = scalar_lea.vmem %s2251_s2, 896  ;;  %p2429_p2 = scmp.lt.s32.totalorder %s2251_s2, %s2251_s2 }
  0x2d   :  { %v256_v30 = vand.u32 4294901760, %v2521_v23  ;;  %155 = vmatprep.subr.mxu0 %v2497_v11  ;;  %v233_v32 = vsub.f32 %v2505_v17, %v232_v24  ;;  %v2546_v34 = vsub.f32 %v120_v21, %v2526_v26  ;;  %v262_v35 = vand.u32 4294901760, %v2529_v27  ;;  %p2425_p1 = scmp.ne.s32.totalorder %s2251_s2, %s2424_s29  ;;  %p2430_p3 = scmp.lt.s32.totalorder %s2424_s29, %s2424_s29 }
  0x2e   :  { %v239_v33 = vsub.f32 %v2510_v19, %v238_v25  ;;  %157 = vmatpush1.msra.mxu0 %v2499_v12  ;;  %v245_v36 = vsub.f32 %v2514_v20, %v244_v28  ;;  %v251_v37 = vsub.f32 %v2518_v22, %v250_v29  ;;  %v268_v39 = vand.u32 4294901760, %v2536_v31 }
  0x2f   :  { %v257_v38 = vsub.f32 %v2521_v23, %v256_v30  ;;  %159 = vmatprep.subr.mxu0 %v2502_v16  ;;  %v234_v40 = vand.u32 4294901760, %v233_v32  ;;  %v2562_v42 = vand.u32 4294901760, %v2546_v34  ;;  %v263_v43 = vsub.f32 %v2529_v27, %v262_v35  ;;  %p2431_p4 = por %p2430_p3, %p2429_p2 }
  0x30   :  { %v240_v41 = vand.u32 4294901760, %v239_v33  ;;  %161 = vmatpush1.msra.mxu0 %v2507_v18  ;;  %v246_v44 = vand.u32 4294901760, %v245_v36  ;;  %v252_v45 = vand.u32 4294901760, %v251_v37  ;;  %v269_v46 = vsub.f32 %v2536_v31, %v268_v39 }
  0x31   :  { %235 = vmatprep.subr.mxu1 %v234_v40  ;;  %344 = vmatprep.subr.mxu0 %v2505_v17  ;;  %v198_v47 = vsub.f32 %v2546_v34, %v2562_v42  ;;  %v258_v48 = vand.u32 4294901760, %v257_v38  ;;  %v2575_v49 = vsub.f32 %v53_v14, %v2507_v18  ;;  %v264_v50 = vand.u32 4294901760, %v263_v43  ;;  %p2432_p5 = pnand %p2431_p4, %p2425_p1 }
  0x32   :  { %241 = vmatpush1.msra.mxu1 %v240_v41  ;;  %v270_v52 = vand.u32 4294901760, %v269_v46  ;;  %v2591_v59 = vand.u32 4294901760, %v77_v56  ;;  %v2595_v61 = vand.u32 4294901760, %v76_v57  ;;  %v2599_v63 = vand.u32 4294901760, %v70_v58  ;;  %v72_v46 = vld [vmem:[#allocation5 + $0x98] sm:$0xff] }
  0x33   :  { %247 = vmatprep.subr.mxu1 %v246_v44  ;;  %v2577_v51 = vand.u32 4294901760, %v198_v47  ;;  %v274_v53 = vand.u32 4294901760, %v2575_v49  ;;  %v2604_v2 = vand.u32 4294901760, %v69_v60  ;;  %v2609_v7 = vand.u32 4294901760, %v63_v62  ;;  %v79_v44 = vld [vmem:[#allocation5 + $0xd0] sm:$0xff] }
  0x34   :  { %253 = vmatpush1.msra.mxu1 %v252_v45  ;;  %v2612_v8 = vsub.f32 %v77_v56, %v2591_v59  ;;  %v2618_v13 = vsub.f32 %v76_v57, %v2595_v61  ;;  %v2620_v14 = vand.u32 4294901760, %v62_v1  ;;  %v2625_v15 = vand.u32 4294901760, %v56_v3  ;;  %v78_v45 = vld [vmem:[#allocation5 + $0xc8] sm:$0xff] }
  0x35   :  { %200 = vmatmul.mubr.f32.vlgmr.msra.gmra.mxu0 %v2577_v51  ;;  %259 = vmatprep.subr.mxu1 %v258_v48  ;;  %v275_v54 = vsub.f32 %v2575_v49, %v274_v53  ;;  %v2628_v17 = vsub.f32 %v70_v58, %v2599_v63  ;;  %v2721_v47 = vand.u32 4294901760, %v79_v44  ;;  %v71_v48 = vld [vmem:[#allocation5 + $0x90] sm:$0xff]  ;;  %v57_v58 = vld [vmem:[#allocation5 + $0x20] sm:$0xff]  ;;  %vm2242_vm2 = vcmask 130048  }
  0x36   :  { %347 = vmatpush1.msra.mxu0 %v2510_v19  ;;  %265 = vmatpush1.msra.mxu1 %v264_v50  ;;  %v2634_v19 = vsub.f32 %v69_v60, %v2604_v2  ;;  %v775_v21 = vand.u32 4294901760, %v2612_v8  ;;  %v65_v50 = vld [vmem:[#allocation5 + $0x60] sm:$0xff] }
  0x37   :  { %350 = vmatprep.subr.mxu0 %v2514_v20  ;;  %271 = vmatprep.subr.mxu1 %v270_v52  ;;  %v276_v55 = vand.u32 4294901760, %v275_v54  ;;  %v2636_v20 = vand.u32 4294901760, %v55_v9  ;;  %v2729_v52 = vand.u32 4294901760, %v72_v46  ;;  %v2734_v54 = vand.u32 4294901760, %v71_v48 }
  0x38   :  { %353 = vmatpush1.msra.mxu0 %v2518_v22  ;;  %398 = vmatprep.mubr.f32.mxu0 %v2455_v0  ;;  %v2643_v22 = vsub.f32 %v63_v62, %v2609_v7  ;;  %v2739_v56 = vand.u32 4294901760, %v65_v50  ;;  %v2742_v57 = vsub.f32 %v79_v44, %v2721_v47 }
  0x39   :  { %356 = vmatprep.subr.mxu0 %v2521_v23  ;;  %277 = vmatpush1.msra.mxu1 %v276_v55  ;;  %v2649_v23 = vsub.f32 %v62_v1, %v2620_v14  ;;  %v58_v55 = vld [vmem:[#allocation5 + $0x28] sm:$0xff] }
  0x3a   :  { %359 = vmatpush1.msra.mxu0 %v2529_v27  ;;  %312 = vmatmul.mubr.f32.vlgmr.msra.gmra.mxu1 %v2526_v26  ;;  %v2655_v27 = vsub.f32 %v56_v3, %v2625_v15  ;;  %v2755_v1 = vand.u32 4294901760, %v58_v55  ;;  %v2758_v3 = vsub.f32 %v72_v46, %v2729_v52 }
  0x3b   :  { %362 = vmatprep.subr.mxu0 %v2536_v31  ;;  %432 = vmatprep.subr.mxu1 %v2489_v4  ;;  %v805_v31 = vand.u32 4294901760, %v2649_v23 }
  0x3c   :  { %365 = vmatpush1.msra.mxu0 %v2575_v49  ;;  %434 = vmatpush1.msra.mxu1 %v2491_v5  ;;  %v811_v32 = vand.u32 4294901760, %v2655_v27  ;;  %v2725_v49 = vand.u32 4294901760, %v78_v45 }
  0x3d   :  { %401 = vmatmul.mubr.f32.vlgmr.msra.gmra.mxu0 %v2546_v34  ;;  %436 = vmatprep.subr.mxu1 %v2493_v6  ;;  %v806_v36 = vsub.f32 %v2649_v23, %v805_v31 }
  0x3e   :  { %516 = vmatprep.subr.mxu0 %v232_v24  ;;  %438 = vmatpush1.msra.mxu1 %v2495_v10  ;;  %v781_v24 = vand.u32 4294901760, %v2618_v13  ;;  %v2748_v60 = vsub.f32 %v78_v45, %v2725_v49 }
  0x3f   :  { %520 = vmatpush1.msra.mxu0 %v238_v25  ;;  %440 = vmatprep.subr.mxu1 %v2497_v11  ;;  %v787_v25 = vand.u32 4294901760, %v2628_v17  ;;  %v807_v40 = vand.u32 4294901760, %v806_v36 }
  0x40   :  { %524 = vmatprep.subr.mxu0 %v244_v28  ;;  %442 = vmatpush1.msra.mxu1 %v2499_v12  ;;  %v2660_v28 = vsub.f32 %v55_v9, %v2636_v20  ;;  %v2766_v9 = vand.u32 4294901760, %v57_v58 }
  0x41   :  { %528 = vmatpush1.msra.mxu0 %v250_v29  ;;  %444 = vmatprep.subr.mxu1 %v2502_v16  ;;  %v793_v29 = vand.u32 4294901760, %v2634_v19 }
  0x42   :  { %532 = vmatprep.subr.mxu0 %v256_v30  ;;  %446 = vmatpush1.msra.mxu1 %v2507_v18  ;;  %v799_v30 = vand.u32 4294901760, %v2643_v22  ;;  %v817_v33 = vand.u32 4294901760, %v2660_v28 }
  0x43   :  { %479 = vmatprep.mubr.f32.mxu1 %v2455_v0  ;;  %536 = vmatpush1.msra.mxu0 %v262_v35 }
  0x44   :  { %483 = vmatmul.mubr.f32.vlgmr.msra.gmra.mxu1 %v2562_v42  ;;  %540 = vmatprep.subr.mxu0 %v268_v39  ;;  %v800_v35 = vsub.f32 %v2643_v22, %v799_v30 }
  0x45   :  { %610 = vmatprep.subr.mxu1 %v2489_v4  ;;  %544 = vmatpush1.msra.mxu0 %v274_v53  ;;  %v776_v4 = vsub.f32 %v2612_v8, %v775_v21  ;;  %v64_v53 = vld [vmem:[#allocation5 + $0x58] sm:$0xff] }
  0x46   :  { %577 = vmatprep.mubr.f32.mxu0 %v2455_v0  ;;  %612 = vmatpush1.msra.mxu1 %v2491_v5  ;;  %v782_v5 = vsub.f32 %v2618_v13, %v781_v24  ;;  %v801_v39 = vand.u32 4294901760, %v800_v35  ;;  %v2750_v62 = vand.u32 4294901760, %v64_v53  ;;  %v80_v35 = vld [vmem:[#allocation5 + $0xd8] sm:$0xff] }
  0x47   :  { %579 = vmatmul.mubr.f32.vlgmr.msra.gmra.mxu0 %v2526_v26  ;;  %614 = vmatprep.subr.mxu1 %v2493_v6  ;;  %v788_v6 = vsub.f32 %v2628_v17, %v787_v25  ;;  %v2855_v36 = vand.u32 4294901760, %v80_v35 }
  0x48   :  { %690 = vmatprep.subr.mxu0 %v2591_v59  ;;  %616 = vmatpush1.msra.mxu1 %v2495_v10  ;;  %v794_v10 = vsub.f32 %v2634_v19, %v793_v29 }
  0x49   :  { %692 = vmatpush1.msra.mxu0 %v2595_v61  ;;  %618 = vmatprep.subr.mxu1 %v2497_v11  ;;  %v777_v11 = vand.u32 4294901760, %v776_v4  ;;  %v789_v37 = vand.u32 4294901760, %v788_v6 }
  0x4a   :  { %694 = vmatprep.subr.mxu0 %v2599_v63  ;;  %620 = vmatpush1.msra.mxu1 %v2499_v12  ;;  %v783_v12 = vand.u32 4294901760, %v782_v5  ;;  %v795_v38 = vand.u32 4294901760, %v794_v10 }
  0x4b   :  { %696 = vmatpush1.msra.mxu0 %v2604_v2  ;;  %622 = vmatprep.subr.mxu1 %v2502_v16  ;;  %v812_v16 = vsub.f32 %v2655_v27, %v811_v32 }
  0x4c   :  { %698 = vmatprep.subr.mxu0 %v2609_v7  ;;  %624 = vmatpush1.msra.mxu1 %v2507_v18  ;;  %v818_v18 = vsub.f32 %v2660_v28, %v817_v33 }
  0x4d   :  { %657 = vmatprep.mubr.f32.mxu1 %v2455_v0  ;;  %700 = vmatpush1.msra.mxu0 %v2620_v14  ;;  %v813_v41 = vand.u32 4294901760, %v812_v16 }
  0x4e   :  { %659 = vmatmul.mubr.f32.vlgmr.msra.gmra.mxu1 %v2526_v26  ;;  %702 = vmatprep.subr.mxu0 %v2625_v15  ;;  %v819_v43 = vand.u32 4294901760, %v818_v18  ;;  %v2871_v18 = vsub.f32 %v80_v35, %v2855_v36 }
  0x4f   :  { %778 = vmatprep.subr.mxu1 %v777_v11  ;;  %704 = vmatpush1.msra.mxu0 %v2636_v20 }
  0x50   :  { %784 = vmatpush1.msra.mxu1 %v783_v12  ;;  %737 = vmatprep.mubr.f32.mxu0 %v2455_v0  ;;  %v73_v12 = vld [vmem:[#allocation5 + $0xa0] sm:$0xff]  ;;  %v1857_v44 = vand.u32 4294901760, %v2871_v18 }
  0x51   :  { %790 = vmatprep.subr.mxu1 %v789_v37  ;;  %887 = vmatprep.subr.mxu0 %v2612_v8  ;;  %v2764_v8 = vsub.f32 %v71_v48, %v2734_v54  ;;  %v66_v37 = vld [vmem:[#allocation5 + $0x68] sm:$0xff]  ;;  %v2862_v16 = vand.u32 4294901760, %v73_v12 }
  0x52   :  { %743 = vmatmul.mubr.f32.vlgmr.msra.gmra.mxu0 %v2577_v51  ;;  %796 = vmatpush1.msra.mxu1 %v795_v38  ;;  %v59_v38 = vld [vmem:[#allocation5 + $0x30] sm:$0xff] }
  0x53   :  { %890 = vmatpush1.msra.mxu0 %v2618_v13  ;;  %802 = vmatprep.subr.mxu1 %v801_v39  ;;  %v1318_v13 = vand.u32 4294901760, %v2742_v57  ;;  %v2873_v39 = vand.u32 4294901760, %v66_v37 }
  0x54   :  { %893 = vmatprep.subr.mxu0 %v2628_v17  ;;  %808 = vmatpush1.msra.mxu1 %v807_v40  ;;  %v2773_v17 = vsub.f32 %v65_v50, %v2739_v56  ;;  %v2882_v40 = vsub.f32 %v73_v12, %v2862_v16 }
  0x55   :  { %896 = vmatpush1.msra.mxu0 %v2634_v19  ;;  %814 = vmatprep.subr.mxu1 %v813_v41  ;;  %v2779_v19 = vsub.f32 %v64_v53, %v2750_v62  ;;  %v2884_v41 = vand.u32 4294901760, %v59_v38 }
  0x56   :  { %899 = vmatprep.subr.mxu0 %v2643_v22  ;;  %820 = vmatpush1.msra.mxu1 %v819_v43  ;;  %v1330_v22 = vand.u32 4294901760, %v2758_v3  ;;  %v2893_v43 = vsub.f32 %v66_v37, %v2873_v39  ;;  %v1864_v46 = vand.u32 4294901760, %v2882_v40 }
  0x57   :  { %853 = vmatprep.mubr.f32.mxu1 %v2455_v0  ;;  %902 = vmatpush1.msra.mxu0 %v2649_v23  ;;  %v2787_v23 = vsub.f32 %v58_v55, %v2755_v1  ;;  %v2902_v45 = vsub.f32 %v59_v38, %v2884_v41 }
  0x58   :  { %855 = vmatmul.mubr.f32.vlgmr.msra.gmra.mxu1 %v2526_v26  ;;  %905 = vmatprep.subr.mxu0 %v2655_v27  ;;  %v1342_v27 = vand.u32 4294901760, %v2773_v17  ;;  %v1871_v48 = vand.u32 4294901760, %v2893_v43 }
  0x59   :  { %975 = vmatprep.subr.mxu1 %v2591_v59  ;;  %908 = vmatpush1.msra.mxu0 %v2660_v28  ;;  %v1348_v28 = vand.u32 4294901760, %v2779_v19  ;;  %v1878_v50 = vand.u32 4294901760, %v2902_v45 }
  0x5a   :  { %941 = vmatprep.mubr.f32.mxu0 %v2455_v0  ;;  %977 = vmatpush1.msra.mxu1 %v2595_v61  ;;  %v1872_v53 = vsub.f32 %v2893_v43, %v1871_v48 }
  0x5b   :  { %944 = vmatmul.mubr.f32.vlgmr.msra.gmra.mxu0 %v2546_v34  ;;  %979 = vmatprep.subr.mxu1 %v2599_v63  ;;  %v1349_v5 = vsub.f32 %v2779_v19, %v1348_v28  ;;  %v1879_v55 = vsub.f32 %v2902_v45, %v1878_v50 }
  0x5c   :  { %1059 = vmatprep.subr.mxu0 %v775_v21  ;;  %981 = vmatpush1.msra.mxu1 %v2604_v2  ;;  %v1324_v21 = vand.u32 4294901760, %v2748_v60 }
  0x5d   :  { %1063 = vmatpush1.msra.mxu0 %v781_v24  ;;  %983 = vmatprep.subr.mxu1 %v2609_v7  ;;  %v2792_v24 = vsub.f32 %v57_v58, %v2766_v9  ;;  %v1350_v10 = vand.u32 4294901760, %v1349_v5  ;;  %v2981_v58 = vld [vmem:[#allocation7] sm:$0x7f] }
  0x5e   :  { %1067 = vmatprep.subr.mxu0 %v787_v25  ;;  %985 = vmatpush1.msra.mxu1 %v2620_v14  ;;  %v1336_v25 = vand.u32 4294901760, %v2764_v8 }
  0x5f   :  { %1071 = vmatpush1.msra.mxu0 %v793_v29  ;;  %987 = vmatprep.subr.mxu1 %v2625_v15  ;;  %v1354_v29 = vand.u32 4294901760, %v2787_v23  ;;  %v1360_v4 = vand.u32 4294901760, %v2792_v24 }
  0x60   :  { %1075 = vmatprep.subr.mxu0 %v799_v30  ;;  %989 = vmatpush1.msra.mxu1 %v2636_v20  ;;  %v1343_v30 = vsub.f32 %v2773_v17, %v1342_v27 }
  0x61   :  { %1022 = vmatprep.mubr.f32.mxu1 %v2455_v0  ;;  %1079 = vmatpush1.msra.mxu0 %v805_v31 }
  0x62   :  { %1026 = vmatmul.mubr.f32.vlgmr.msra.gmra.mxu1 %v2562_v42  ;;  %1083 = vmatprep.subr.mxu0 %v811_v32  ;;  %v1344_v32 = vand.u32 4294901760, %v1343_v30 }
  0x63   :  { %1153 = vmatprep.subr.mxu1 %v2591_v59  ;;  %1087 = vmatpush1.msra.mxu0 %v817_v33  ;;  %v1319_v59 = vsub.f32 %v2742_v57, %v1318_v13 }
  0x64   :  { %1120 = vmatprep.mubr.f32.mxu0 %v2455_v0  ;;  %1155 = vmatpush1.msra.mxu1 %v2595_v61  ;;  %v1325_v61 = vsub.f32 %v2748_v60, %v1324_v21 }
  0x65   :  { %1122 = vmatmul.mubr.f32.vlgmr.msra.gmra.mxu0 %v2526_v26  ;;  %1157 = vmatprep.subr.mxu1 %v2599_v63  ;;  %v1331_v63 = vsub.f32 %v2758_v3, %v1330_v22 }
  0x66   :  { %1233 = vmatprep.subr.mxu0 %v2721_v47  ;;  %1159 = vmatpush1.msra.mxu1 %v2604_v2  ;;  %v1337_v2 = vsub.f32 %v2764_v8, %v1336_v25 }
  0x67   :  { %1235 = vmatpush1.msra.mxu0 %v2725_v49  ;;  %1161 = vmatprep.subr.mxu1 %v2609_v7  ;;  %v1320_v7 = vand.u32 4294901760, %v1319_v59  ;;  %v1332_v31 = vand.u32 4294901760, %v1331_v63 }
  0x68   :  { %1237 = vmatprep.subr.mxu0 %v2729_v52  ;;  %1163 = vmatpush1.msra.mxu1 %v2620_v14  ;;  %v1326_v14 = vand.u32 4294901760, %v1325_v61  ;;  %v1338_v6 = vand.u32 4294901760, %v1337_v2 }
  0x69   :  { %1239 = vmatpush1.msra.mxu0 %v2734_v54  ;;  %1165 = vmatprep.subr.mxu1 %v2625_v15  ;;  %v1355_v15 = vsub.f32 %v2787_v23, %v1354_v29 }
  0x6a   :  { %1241 = vmatprep.subr.mxu0 %v2739_v56  ;;  %1167 = vmatpush1.msra.mxu1 %v2636_v20  ;;  %v1361_v20 = vsub.f32 %v2792_v24, %v1360_v4 }
  0x6b   :  { %1200 = vmatprep.mubr.f32.mxu1 %v2455_v0  ;;  %1243 = vmatpush1.msra.mxu0 %v2750_v62  ;;  %v1356_v33 = vand.u32 4294901760, %v1355_v15 }
  0x6c   :  { %1202 = vmatmul.mubr.f32.vlgmr.msra.gmra.mxu1 %v2526_v26  ;;  %1245 = vmatprep.subr.mxu0 %v2755_v1  ;;  %v1362_v11 = vand.u32 4294901760, %v1361_v20 }
  0x6d   :  { %1321 = vmatprep.subr.mxu1 %v1320_v7  ;;  %1247 = vmatpush1.msra.mxu0 %v2766_v9 }
  0x6e   :  { %1327 = vmatpush1.msra.mxu1 %v1326_v14  ;;  %1280 = vmatprep.mubr.f32.mxu0 %v2455_v0 }
  0x6f   :  { %1333 = vmatprep.subr.mxu1 %v1332_v31  ;;  %1430 = vmatprep.subr.mxu0 %v2742_v57  ;;  %v1880_v57 = vand.u32 4294901760, %v1879_v55 }
  0x70   :  { %1286 = vmatmul.mubr.f32.vlgmr.msra.gmra.mxu0 %v2577_v51  ;;  %1339 = vmatpush1.msra.mxu1 %v1338_v6 }
  0x71   :  { %1433 = vmatpush1.msra.mxu0 %v2748_v60  ;;  %1345 = vmatprep.subr.mxu1 %v1344_v32 }
  0x72   :  { %1436 = vmatprep.subr.mxu0 %v2758_v3  ;;  %1351 = vmatpush1.msra.mxu1 %v1350_v10 }
  0x73   :  { %1439 = vmatpush1.msra.mxu0 %v2764_v8  ;;  %1357 = vmatprep.subr.mxu1 %v1356_v33 }
  0x74   :  { %1442 = vmatprep.subr.mxu0 %v2773_v17  ;;  %1363 = vmatpush1.msra.mxu1 %v1362_v11 }
  0x75   :  { %1396 = vmatprep.mubr.f32.mxu1 %v2455_v0  ;;  %1445 = vmatpush1.msra.mxu0 %v2779_v19 }
  0x76   :  { %1398 = vmatmul.mubr.f32.vlgmr.msra.gmra.mxu1 %v2526_v26  ;;  %1448 = vmatprep.subr.mxu0 %v2787_v23 }
  0x77   :  { %1518 = vmatprep.subr.mxu1 %v2721_v47  ;;  %1451 = vmatpush1.msra.mxu0 %v2792_v24 }
  0x78   :  { %1484 = vmatprep.mubr.f32.mxu0 %v2455_v0  ;;  %1520 = vmatpush1.msra.mxu1 %v2725_v49 }
  0x79   :  { %1487 = vmatmul.mubr.f32.vlgmr.msra.gmra.mxu0 %v2546_v34  ;;  %1522 = vmatprep.subr.mxu1 %v2729_v52 }
  0x7a   :  { %1602 = vmatprep.subr.mxu0 %v1318_v13  ;;  %1524 = vmatpush1.msra.mxu1 %v2734_v54 }
  0x7b   :  { %1606 = vmatpush1.msra.mxu0 %v1324_v21  ;;  %1526 = vmatprep.subr.mxu1 %v2739_v56 }
  0x7c   :  { %1610 = vmatprep.subr.mxu0 %v1330_v22  ;;  %1528 = vmatpush1.msra.mxu1 %v2750_v62 }
  0x7d   :  { %1614 = vmatpush1.msra.mxu0 %v1336_v25  ;;  %1530 = vmatprep.subr.mxu1 %v2755_v1 }
  0x7e   :  { %1618 = vmatprep.subr.mxu0 %v1342_v27  ;;  %1532 = vmatpush1.msra.mxu1 %v2766_v9 }
  0x7f   :  { %1565 = vmatprep.mubr.f32.mxu1 %v2455_v0  ;;  %1622 = vmatpush1.msra.mxu0 %v1348_v28 }
  0x80   :  { %1569 = vmatmul.mubr.f32.vlgmr.msra.gmra.mxu1 %v2562_v42  ;;  %1626 = vmatprep.subr.mxu0 %v1354_v29 }
  0x81   :  { %1696 = vmatprep.subr.mxu1 %v2721_v47  ;;  %1630 = vmatpush1.msra.mxu0 %v1360_v4  ;;  %v1858_v47 = vsub.f32 %v2871_v18, %v1857_v44 }
  0x82   :  { %1663 = vmatprep.mubr.f32.mxu0 %v2455_v0  ;;  %1698 = vmatpush1.msra.mxu1 %v2725_v49  ;;  %v1865_v49 = vsub.f32 %v2882_v40, %v1864_v46 }
  0x83   :  { %1665 = vmatmul.mubr.f32.vlgmr.msra.gmra.mxu0 %v2526_v26  ;;  %1700 = vmatprep.subr.mxu1 %v2729_v52  ;;  %v1859_v52 = vand.u32 4294901760, %v1858_v47 }
  0x84   :  { %2290 = vmatprep.subr.mxu0 %v2455_v0  ;;  %1702 = vmatpush1.msra.mxu1 %v2734_v54  ;;  %v1866_v54 = vand.u32 4294901760, %v1865_v49 }
  0x85   :  { %2291 = vmatpush3.msra.mxu0 %v2855_v36  ;;  %1704 = vmatprep.subr.mxu1 %v2739_v56  ;;  %v1873_v56 = vand.u32 4294901760, %v1872_v53 }
  0x86   :  { %2292 = vmatprep.subr.mxu0 %v2455_v0  ;;  %1706 = vmatpush1.msra.mxu1 %v2750_v62 }
  0x87   :  { %2293 = vmatpush3.msra.mxu0 %v2862_v16  ;;  %1708 = vmatprep.subr.mxu1 %v2755_v1 }
  0x88   :  { %2294 = vmatprep.subr.mxu0 %v2455_v0  ;;  %1710 = vmatpush1.msra.mxu1 %v2766_v9 }
  0x89   :  { %1743 = vmatprep.mubr.f32.mxu1 %v2455_v0  ;;  %2295 = vmatpush3.msra.mxu0 %v2873_v39 }
  0x8a   :  { %1745 = vmatmul.mubr.f32.vlgmr.msra.gmra.mxu1 %v2526_v26  ;;  %2296 = vmatprep.subr.mxu0 %v2455_v0 }
  0x8b   :  { %2301 = vmatprep.subr.mxu1 %v2455_v0  ;;  %2297 = vmatpush3.msra.mxu0 %v2884_v41 }
  0x8c   :  { %2302 = vmatpush3.msra.mxu1 %v1859_v52  ;;  %2298 = vmatprep.mubr.msk.f32.mxu0 %vm2456_vm1, %v2455_v0 }
  0x8d   :  { %2303 = vmatprep.subr.mxu1 %v2455_v0  ;;  %2312 = vmatprep.subr.mxu0 %v2455_v0 }
  0x8e   :  { %2299 = vmatmul.mubr.f32.vlgmr.msra.gmra.mxu0 %v2577_v51  ;;  %2304 = vmatpush3.msra.mxu1 %v1866_v54 }
  0x8f   :  { %2313 = vmatpush3.msra.mxu0 %v2871_v18  ;;  %2305 = vmatprep.subr.mxu1 %v2455_v0 }
  0x90   :  { %2314 = vmatprep.subr.mxu0 %v2455_v0  ;;  %2306 = vmatpush3.msra.mxu1 %v1873_v56 }
  0x91   :  { %2315 = vmatpush3.msra.mxu0 %v2882_v40  ;;  %2307 = vmatprep.subr.mxu1 %v2455_v0 }
  0x92   :  { %2316 = vmatprep.subr.mxu0 %v2455_v0  ;;  %2308 = vmatpush3.msra.mxu1 %v1880_v57 }
  0x93   :  { %2309 = vmatprep.mubr.msk.f32.mxu1 %vm2456_vm1, %v2455_v0  ;;  %2317 = vmatpush3.msra.mxu0 %v2893_v43 }
  0x94   :  { %2310 = vmatmul.mubr.f32.vlgmr.msra.gmra.mxu1 %v2526_v26  ;;  %2318 = vmatprep.subr.mxu0 %v2455_v0 }
  0x95   :  { %2323 = vmatprep.subr.mxu1 %v2455_v0  ;;  %2319 = vmatpush3.msra.mxu0 %v2902_v45 }
  0x96   :  { %2324 = vmatpush3.msra.mxu1 %v2855_v36  ;;  %2320 = vmatprep.mubr.msk.f32.mxu0 %vm2456_vm1, %v2455_v0 }
  0x97   :  { %2325 = vmatprep.subr.mxu1 %v2455_v0  ;;  %2334 = vmatprep.subr.mxu0 %v2455_v0 }
  0x98   :  { %2321 = vmatmul.mubr.f32.vlgmr.msra.gmra.mxu0 %v2546_v34  ;;  %2326 = vmatpush3.msra.mxu1 %v2862_v16  ;;  %v83_v34 = vlaneseq }
  0x99   :  { %2335 = vmatpush3.msra.mxu0 %v1857_v44  ;;  %2327 = vmatprep.subr.mxu1 %v2455_v0 }
  0x9a   :  { %2336 = vmatprep.subr.mxu0 %v2455_v0  ;;  %2328 = vmatpush3.msra.mxu1 %v2873_v39 }
  0x9b   :  { %2337 = vmatpush3.msra.mxu0 %v1864_v46  ;;  %2329 = vmatprep.subr.mxu1 %v2455_v0 }
  0x9c   :  { %2338 = vmatprep.subr.mxu0 %v2455_v0  ;;  %2330 = vmatpush3.msra.mxu1 %v2884_v41 }
  0x9d   :  { %2331 = vmatprep.mubr.msk.f32.mxu1 %vm2456_vm1, %v2455_v0  ;;  %2339 = vmatpush3.msra.mxu0 %v1871_v48 }
  0x9e   :  { %2332 = vmatmul.mubr.f32.vlgmr.msra.gmra.mxu1 %v2562_v42  ;;  %2340 = vmatprep.subr.mxu0 %v2455_v0  ;;  %v2978_v42 = vshrl.u32 %v83_v34, 7 }
  0x9f   :  { %2345 = vmatprep.subr.mxu1 %v2455_v0  ;;  %2341 = vmatpush3.msra.mxu0 %v1878_v50 }
  0xa0   :  { %2342 = vmatprep.mubr.msk.f32.mxu0 %vm2456_vm1, %v2455_v0  ;;  %2346 = vmatpush3.msra.mxu1 %v2855_v36  ;;  %v85_v51 = vsub.s32 0, %v2978_v42  ;;  %v89_v60 = vsub.s32 1, %v2978_v42  ;;  %v93_v5 = vsub.s32 2, %v2978_v42  ;;  %v97_v31 = vsub.s32 3, %v2978_v42 }
  0xa1   :  { %2343 = vmatmul.mubr.f32.vlgmr.msra.gmra.mxu0 %v2526_v26  ;;  %2347 = vmatprep.subr.mxu1 %v2455_v0  ;;  %v101_v53 = vsub.s32 4, %v2978_v42  ;;  %v105_v54 = vsub.s32 5, %v2978_v42 }
  0xa2   :  { %2348 = vmatpush3.msra.mxu1 %v2862_v16  ;;  %2353 = vmatprep.mubr.msk.f32.mxu1 %vm2456_vm1, %v2455_v0  ;;  %v86_v1 = vrot.slane %v2981_v58, %v85_v51  ;;  %v90_v3 = vrot.slane %v2981_v58, %v89_v60  ;;  %v94_v6 = vrot.slane %v2981_v58, %v93_v5 }
  0xa3   :  { %2349 = vmatprep.subr.mxu1 %v2455_v0  ;;  %v98_v20 = vrot.slane %v2981_v58, %v97_v31  ;;  %v102_v56 = vrot.slane %v2981_v58, %v101_v53  ;;  %v106_v57 = vrot.slane %v2981_v58, %v105_v54 }
  0xa4   :  { %2350 = vmatpush3.msra.mxu1 %v2873_v39 }
  0xa5   :  { %2351 = vmatprep.subr.mxu1 %v2455_v0 }
  0xa6   :  { %2352 = vmatpush3.msra.mxu1 %v2884_v41 }
  0xa7   :  { %2354 = vmatmul.mubr.f32.vlgmr.msra.gmra.mxu1 %v2526_v26 }
  0xf5   :  { %v201_v62 = vpop.f32.mrf.mxu0 }
  0xf6   :  { %v202_v9 = vadd.f32 %v201_v62, %v86_v1 }
  0xf7   :  { %v203_v8 = vpop.f32.mrf.mxu0 }
  0xf8   :  { %v204_v13 = vadd.f32 %v203_v8, %v90_v3 }
  0xfa   :  { %v313_v0 = vpop.f32.mrf.mxu1 }
  0xfb   :  { %v314_v19 = vadd.f32 %v313_v0, %v202_v9 }
  0xfc   :  { %v315_v17 = vpop.f32.mrf.mxu1 }
  0xfd   :  { %v402_v26 = vpop.f32.mrf.mxu0  ;;  %v316_v22 = vadd.f32 %v315_v17, %v204_v13 }
  0xfe   :  { %v403_v24 = vadd.f32 %v402_v26, %v314_v19 }
  0xff   :  { %v404_v23 = vpop.f32.mrf.mxu0 }
 0x100   :  { %v405_v27 = vadd.f32 %v404_v23, %v316_v22 }
 0x104   :  { %v484_v21 = vpop.f32.mrf.mxu1 }
 0x105   :  { %v485_v61 = vadd.f32 %v484_v21, %v403_v24 }
 0x106   :  { %v486_v25 = vpop.f32.mrf.mxu1 }
 0x107   :  { %v580_v59 = vpop.f32.mrf.mxu0  ;;  %v487_v28 = vadd.f32 %v486_v25, %v405_v27 }
 0x108   :  { %v581_v29 = vadd.f32 %v580_v59, %v485_v61 }
 0x109   :  { %v582_v63 = vpop.f32.mrf.mxu0 }
 0x10a   :  { %v583_v4 = vadd.f32 %v582_v63, %v487_v28 }
 0x10e   :  { %v660_v2 = vpop.f32.mrf.mxu1 }
 0x10f   :  { %v661_v7 = vadd.f32 %v660_v2, %v581_v29  ;;  %v109_v2 = vsub.s32 6, %v2978_v42 }
 0x110   :  { %v662_v30 = vpop.f32.mrf.mxu1 }
 0x111   :  { %2236 = vst [vmem:[#allocation8] sm:$0xff] %v661_v7  ;;  %v663_v14 = vadd.f32 %v662_v30, %v583_v4  ;;  %v110_v7 = vrot.slane %v2981_v58, %v109_v2 }
 0x112   :  { %v744_v15 = vpop.f32.mrf.mxu0 }
 0x113   :  { %2237 = vst [vmem:[#allocation8 + $0x8] sm:$0xff] %v663_v14  ;;  %v745_v33 = vadd.f32 %v744_v15, %v94_v6 }
 0x114   :  { %v746_v32 = vpop.f32.mrf.mxu0 }
 0x115   :  { %v747_v11 = vadd.f32 %v746_v32, %v98_v20 }
 0x118   :  { %v856_v10 = vpop.f32.mrf.mxu1 }
 0x119   :  { %v857_v36 = vadd.f32 %v856_v10, %v745_v33 }
 0x11a   :  { %v858_v35 = vpop.f32.mrf.mxu1 }
 0x11b   :  { %v945_v12 = vpop.f32.mrf.mxu0  ;;  %v859_v16 = vadd.f32 %v858_v35, %v747_v11 }
 0x11c   :  { %v946_v18 = vadd.f32 %v945_v12, %v857_v36 }
 0x11d   :  { %v947_v38 = vpop.f32.mrf.mxu0 }
 0x11e   :  { %v948_v41 = vadd.f32 %v947_v38, %v859_v16 }
 0x122   :  { %v1027_v37 = vpop.f32.mrf.mxu1 }
 0x123   :  { %v1028_v43 = vadd.f32 %v1027_v37, %v946_v18 }
 0x124   :  { %v1029_v39 = vpop.f32.mrf.mxu1 }
 0x125   :  { %v1123_v40 = vpop.f32.mrf.mxu0  ;;  %v1030_v44 = vadd.f32 %v1029_v39, %v948_v41 }
 0x126   :  { %v1124_v46 = vadd.f32 %v1123_v40, %v1028_v43 }
 0x127   :  { %v1125_v45 = vpop.f32.mrf.mxu0 }
 0x128   :  { %v1126_v48 = vadd.f32 %v1125_v45, %v1030_v44 }
 0x12c   :  { %v1203_v47 = vpop.f32.mrf.mxu1 }
 0x12d   :  { %v1204_v49 = vadd.f32 %v1203_v47, %v1124_v46 }
 0x12e   :  { %v1205_v50 = vpop.f32.mrf.mxu1 }
 0x12f   :  { %2238 = vst [vmem:[#allocation8 + $0x10] sm:$0xff] %v1204_v49  ;;  %v1206_v52 = vadd.f32 %v1205_v50, %v1126_v48 }
 0x130   :  { %v1287_v55 = vpop.f32.mrf.mxu0 }
 0x131   :  { %2239 = vst [vmem:[#allocation8 + $0x18] sm:$0xff] %v1206_v52  ;;  %v1288_v60 = vadd.f32 %v1287_v55, %v102_v56 }
 0x132   :  { %v1289_v34 = vpop.f32.mrf.mxu0 }
 0x133   :  { %v1290_v62 = vadd.f32 %v1289_v34, %v106_v57 }
 0x136   :  { %v1399_v51 = vpop.f32.mrf.mxu1 }
 0x137   :  { %v1400_v8 = vadd.f32 %v1399_v51, %v1288_v60 }
 0x138   :  { %v1401_v1 = vpop.f32.mrf.mxu1 }
 0x139   :  { %v1488_v3 = vpop.f32.mrf.mxu0  ;;  %v1402_v9 = vadd.f32 %v1401_v1, %v1290_v62 }
 0x13a   :  { %v1489_v17 = vadd.f32 %v1488_v3, %v1400_v8 }
 0x13b   :  { %v1490_v13 = vpop.f32.mrf.mxu0 }
 0x13c   :  { %v1491_v21 = vadd.f32 %v1490_v13, %v1402_v9 }
 0x140   :  { %v1570_v0 = vpop.f32.mrf.mxu1 }
 0x141   :  { %v1571_v22 = vadd.f32 %v1570_v0, %v1489_v17 }
 0x142   :  { %v1572_v26 = vpop.f32.mrf.mxu1 }
 0x143   :  { %v1666_v19 = vpop.f32.mrf.mxu0  ;;  %v1573_v23 = vadd.f32 %v1572_v26, %v1491_v21 }
 0x144   :  { %v1667_v25 = vadd.f32 %v1666_v19, %v1571_v22 }
 0x145   :  { %v1668_v24 = vpop.f32.mrf.mxu0 }
 0x146   :  { %v1669_v27 = vadd.f32 %v1668_v24, %v1573_v23 }
 0x14a   :  { %v1746_v59 = vpop.f32.mrf.mxu1 }
 0x14b   :  { %v1747_v61 = vadd.f32 %v1746_v59, %v1667_v25 }
 0x14c   :  { %v1748_v28 = vpop.f32.mrf.mxu1 }
 0x14d   :  { %2240 = vst [vmem:[#allocation8 + $0x20] sm:$0xff] %v1747_v61  ;;  %v1749_v63 = vadd.f32 %v1748_v28, %v1669_v27 }
 0x14e   :  { %v1826_v29 = vpop.f32.mrf.mxu0 }
 0x14f   :  { %2241 = vst [vmem:[#allocation8 + $0x28] sm:$0xff] %v1749_v63  ;;  %v1827_v5 = vadd.f32 %v1826_v29, %v110_v7 }
 0x150   :  { %v2300_v4 = vpop.f32.mrf.mxu0 }
 0x154   :  { %v1917_v30 = vpop.f32.mrf.mxu1 }
 0x155   :  { %v1918_v6 = vadd.f32 %v1917_v30, %v1827_v5 }
 0x156   :  { %v2311_v14 = vpop.f32.mrf.mxu1 }
 0x158   :  { %v1997_v31 = vpop.f32.mrf.mxu0 }
 0x159   :  { %v1998_v32 = vadd.f32 %v1997_v31, %v1918_v6 }
 0x15a   :  { %v2322_v15 = vpop.f32.mrf.mxu0 }
 0x15e   :  { %v2074_v20 = vpop.f32.mrf.mxu1 }
 0x15f   :  { %v2075_v11 = vadd.f32 %v2074_v20, %v1998_v32 }
 0x160   :  { %v2333_v10 = vpop.f32.mrf.mxu1 }
 0x161   :  { %v2157_v33 = vpop.f32.mrf.mxu0 }
 0x162   :  { %v2158_v12 = vadd.f32 %v2157_v33, %v2075_v11 }
 0x163   :  { %v2344_v35 = vpop.f32.mrf.mxu0 }
 0x167   :  { %v2232_v36 = vpop.f32.mrf.mxu1 }
 0x168   :  { %v2233_v42 = vadd.f32 %v2232_v36, %v2158_v12 }
 0x169   :  { %v2355_v58 = vpop.f32.mrf.mxu1 }
 0x16a   :  { %2243 = vst.msk [vmem:[#allocation8 + $0x30] sm:$0xff] %vm2242_vm2, %v2233_v42 }
 0x16b   :  { %2435 = shalt.err (!%p2432_p5)
}
 0x16c   :  { %2253 = dma.vmem_to_hbm [thread:$0]  %s2251_s2, 896, %s3002_s3, [#allocation4]  }
 0x16d   :  { %2448 = dma.done.wait [#allocation4], 896  }
 0x16e   :  { %2449 = vsyncadd [#allocation4], 4294966400 }
 0x16f   :  { %2257 = vsyncpa [#allocation3], 1 }
 0x170   :  { %2258 = vsyncpa [#allocation6], 1 }
 0x171   :  { %2259 = vsyncpa [#allocation4], 1 }

</bundles_post_ra>
